<compile_context>
chip_gen: v7x
topology: tpu7x:2x2x1
jax: 0.10.0
libtpu: 0.0.40
codegen_flags: <defaults>
</compile_context>

<pallas_src>
import jax
import jax.numpy as jnp
from jax import lax
from jax.experimental import pallas as pl
from jax.experimental.pallas import tpu as pltpu


# ----------------------------- Pallas kernel ------------------------------- #

def _patch_gather_kernel(idx_ref, xt_ref, out_ref):
    """Gather undropped patches for the WHOLE batch with one one-hot MXU matmul.

    idx_ref : VMEM (1, B*U) int32   -- global (batch-offset) selected patch ids
    xt_ref  : VMEM (K*C, B*P) float -- lane-dense patch slab (patches along lanes)
    out_ref : VMEM (K*C, B*U)       -- gathered (undropped) patches
    """
    BP = xt_ref.shape[1]
    BU = out_ref.shape[1]

    targets = idx_ref[...]                                    # (1, BU) lane-major
    gid = lax.broadcasted_iota(jnp.int32, (BP, BU), 0)        # global patch id / sublane
    onehot_t = (gid == targets).astype(xt_ref.dtype)          # (BP, BU) block-diag 1-hot^T

    res = jnp.dot(xt_ref[...], onehot_t,                      # (KC, BP) @ (BP, BU)
                  preferred_element_type=jnp.float32)
    out_ref[...] = res.astype(out_ref.dtype)


def patch_gather(xt, idx_global):
    """xt: (KC, B*P) float, idx_global: (1, B*U) int32 -> (KC, B*U)."""
    KC, BP = xt.shape
    BU = idx_global.shape[1]

    # TODO(synk): for large P / K*C, switch to an index_map-driven gather
    # (PrefetchScalarGridSpec, scalar-prefetched page table) so only selected
    # patches are DMA'd, and size double-buffered tiles against v7x's smaller
    # VMEM (32 MiB scoped / 64 MiB physical) via CompilerParams(vmem_limit_bytes=...).
    return pl.pallas_call(
        _patch_gather_kernel,
        out_shape=jax.ShapeDtypeStruct((KC, BU), xt.dtype),
        in_specs=[pl.BlockSpec(memory_space=pltpu.MemorySpace.VMEM),
                  pl.BlockSpec(memory_space=pltpu.MemorySpace.VMEM)],
        out_specs=pl.BlockSpec(memory_space=pltpu.MemorySpace.VMEM),
        cost_estimate=pl.CostEstimate(
            flops=2 * KC * BP * BU,
            transcendentals=0,
            bytes_accessed=4 * (KC * BP + BU + KC * BU)),
    )(idx_global, xt)


# ------------------------------- JAX glue ----------------------------------- #

def _pad_or_crop(x, height, width):
    """Mirror of Patch_Dropout.Padding: zero-pad up to / crop down to (height, width)."""
    b, c, h, w = x.shape
    if h < height:
        x = jnp.pad(x, ((0, 0), (0, 0), (0, height - h), (0, 0)))
    else:
        x = x[:, :, :height, :]
    if w < width:
        x = jnp.pad(x, ((0, 0), (0, 0), (0, 0), (0, width - w)))
    else:
        x = x[:, :, :, :width]
    return x


def _unfold_to_patches(x, kernel_size, patch_nums):
    """F.unfold(x, k, stride=k).view(b, c, kh*kw, P) for non-overlapping patches."""
    b, c, h, w = x.shape
    kh, kw = kernel_size
    P = (h // kh) * (w // kw)
    assert P == patch_nums
    # x_unf[b, ch, ki*kw+kj, io*(w//kw)+jo] = x[b, ch, io*kh+ki, jo*kw+kj]
    x_r = x.reshape(b, c, h // kh, kh, w // kw, kw)
    x_unf = x_r.transpose(0, 1, 3, 5, 2, 4).reshape(b, c, kh * kw, P)
    return x_unf


def patch_dropout_forward(x, idx, *, kernel_size=(2, 2), stride=(2, 2),
                          padding=True, padding_size=(16, 16), patch_nums=64):
    """Pallas-backed forward matching Patch_Dropout.forward (same random indices)."""
    assert kernel_size == stride  # module defaults: non-overlapping unfold
    if padding:
        x = _pad_or_crop(x, padding_size[0], padding_size[1])
    b, c, h, w = x.shape
    kh, kw = kernel_size
    K = kh * kw
    P = patch_nums
    U = idx.shape[1]

    x_unf = _unfold_to_patches(x, kernel_size, P)                 # (b, c, K, P)
    # Lane-dense slab for the kernel: xt[k*C + ch, b*P + p] = x_unf[b, ch, k, p]
    xt = jnp.transpose(x_unf, (2, 1, 0, 3)).reshape(K * c, b * P)

    # Global (batch-offset) patch ids, lane-major; OOB indices are clipped.
    idx_c = jnp.clip(idx.astype(jnp.int32), 0, P - 1)             # (b, U)
    idx_global = (idx_c + jnp.arange(b, dtype=jnp.int32)[:, None] * P).reshape(1, b * U)

    out_t = patch_gather(xt, idx_global)                          # (K*C, B*U)

    # Final PyTorch layout: out[b, k*U + j, ch] = out_t[k*C + ch, b*U + j]
    out = out_t.reshape(K, c, b, U).transpose(2, 0, 3, 1).reshape(b, K * U, c)
    return out


def reference_forward(x, idx, *, kernel_size=(2, 2), padding_size=(16, 16),
                      patch_nums=64):
    """Pure-JAX mirror of the PyTorch forward (using the same sampled indices)."""
    x = _pad_or_crop(x, padding_size[0], padding_size[1])
    b, c, h, w = x.shape
    x_unf = _unfold_to_patches(x, kernel_size, patch_nums)        # (b, c, K, P)
    gathered = jnp.take_along_axis(x_unf, idx[:, None, None, :], axis=3)
    out = gathered.reshape(b, c, -1).transpose(0, 2, 1)
    return out


# --------------------------------- main ------------------------------------- #

if __name__ == "__main__":
    B, C, H, W = 2, 4, 12, 20
    kernel_size = (2, 2)
    padding_size = (16, 16)     # H is padded 12->16, W is cropped 20->16
    PATCH_NUMS = (padding_size[0] // kernel_size[0]) * (padding_size[1] // kernel_size[1])  # 64
    PATCH_DROPOUT_R = 0.5
    U = PATCH_NUMS - int(PATCH_NUMS * PATCH_DROPOUT_R)            # 32 undropped patches

    key = jax.random.PRNGKey(0)
    kx, kidx = jax.random.split(key)
    x = jax.random.normal(kx, (B, C, H, W), dtype=jnp.float32)

    # torch.multinomial(ones, U) == uniform sampling without replacement:
    # first U entries of a random permutation, per batch element.
    # TODO(synk): index sampling stays in plain JAX (host-side glue), not in-kernel PRNG.
    idx = jnp.stack([
        jax.random.permutation(jax.random.fold_in(kidx, i), PATCH_NUMS)[:U]
        for i in range(B)
    ]).astype(jnp.int32)

    # Jit the whole forward so the layout glue (pad/unfold/transposes) fuses
    # into one XLA program around the single Pallas call.
    fwd = jax.jit(lambda xx, ii: patch_dropout_forward(
        xx, ii, kernel_size=kernel_size, stride=kernel_size,
        padding=True, padding_size=padding_size, patch_nums=PATCH_NUMS))

    out = jax.block_until_ready(fwd(x, idx))

    ref = reference_forward(
        x, idx, kernel_size=kernel_size, padding_size=padding_size,
        patch_nums=PATCH_NUMS)

    assert out.shape == (B, kernel_size[0] * kernel_size[1] * U, C), out.shape
    # Exact equality: a gather must be bit-exact (catches any precision regression
    # in the one-hot MXU path).
    assert bool(jnp.array_equal(out, ref)), "Pallas output mismatch vs reference"
    print("KERNEL_OK")
</pallas_src>

<mosaic_0001>
module attributes {stable_mosaic.version = 11 : i64} {
  func.func @_patch_gather_kernel(%arg0: memref<1x64xi32, #tpu.memory_space<vmem>>, %arg1: memref<16x128xf32, #tpu.memory_space<vmem>>, %arg2: memref<16x64xf32, #tpu.memory_space<vmem>>) attributes {dimension_semantics = [], scalar_prefetch = 0 : i64, scratch_operands = 0 : i64, tpu.core_type = #tpu.core_type<tc>} {
    %c0 = arith.constant 0 : index
    %c0_0 = arith.constant 0 : index
    %0 = vector.load %arg0[%c0, %c0_0] : memref<1x64xi32, #tpu.memory_space<vmem>>, vector<1x64xi32>
    %1 = tpu.iota {dimensions = array<i32: 0>} : vector<128x64xi32>
    %2 = vector.broadcast %0 : vector<1x64xi32> to vector<128x64xi32>
    %3 = arith.cmpi eq, %1, %2 : vector<128x64xi32>
    %4 = arith.extui %3 : vector<128x64xi1> to vector<128x64xi32>
    %5 = arith.sitofp %4 : vector<128x64xi32> to vector<128x64xf32>
    %c0_1 = arith.constant 0 : index
    %c0_2 = arith.constant 0 : index
    %6 = vector.load %arg1[%c0_1, %c0_2] : memref<16x128xf32, #tpu.memory_space<vmem>>, vector<16x128xf32>
    %cst = arith.constant dense<0.000000e+00> : vector<16x64xf32>
    %7 = tpu.matmul %6, %5, %cst {dimension_numbers = #tpu.dot_dimension_numbers<[1], [0], [0], [1], [0, 0, 1, 1], [], []>} : vector<16x128xf32>, vector<128x64xf32>, vector<16x64xf32> -> vector<16x64xf32>
    %c0_3 = arith.constant 0 : index
    %c0_4 = arith.constant 0 : index
    %8 = vector.load %arg2[%c0_3, %c0_4] : memref<16x64xf32, #tpu.memory_space<vmem>>, vector<16x64xf32>
    tpu.vector_store %arg2[%c0_3, %c0_4], %7 {strides = array<i32>} : memref<16x64xf32, #tpu.memory_space<vmem>>, vector<16x64xf32>,
    return
  }
}

</mosaic_0001>

<bundles_post_ra>
// kernel: _lambda_.1
= control target key start
LH: loop header
LB: loop body
LE: loop exit
PB: predicated region body
PF: predicated region fallthrough
CT: control target
= control target key end

     0   :  { %v12_v0 = vlaneseq  ;;  %v284_v9 = vmov 1.0|1.0   ;;  %s315_s0 = inlined_call_operand.vmem [shape: s32[1,64], index: 0, kind: input, shape index: {}]   ;;  %s316_s1 = inlined_call_operand.vmem [shape: f32[16,128], index: 1, kind: input, shape index: {}]   ;;  %s317_s2 = inlined_call_operand.vmem [shape: f32[16,64], index: 2, kind: output, shape index: {}]  }
   0x1   :  { %v165_v1 = vld [vmem:[%s315_s0] ss:$0 sm:$0xff]  ;;  %v82_v20 = vld [vmem:[%s316_s1 + $0x8] sm:$0xff] }
   0x2   :  { %v81_v2 = vld [vmem:[%s316_s1] sm:$0xff]  ;;  %v13_v3 = vshrl.u32 %v12_v0, 7 }
   0x3   :  { %248 = vmatprep.mubr.f32.mxu0 %v81_v2 }
   0x4   :  { %v14_v4 = vadd.s32 8, %v13_v3  ;;  %vm33_vm0 = vcmp.eq.s32.totalorder %v13_v3, %v165_v1  ;;  %v15_v5 = vadd.s32 16, %v13_v3  ;;  %v16_v6 = vadd.s32 24, %v13_v3 }
   0x5   :  { %v17_v7 = vadd.s32 32, %v13_v3  ;;  %v18_v8 = vadd.s32 40, %v13_v3  ;;  %v19_v10 = vadd.s32 48, %v13_v3  ;;  %v20_v11 = vadd.s32 56, %v13_v3 }
   0x6   :  { %vm34_vm1 = vcmp.eq.s32.totalorder %v14_v4, %v165_v1  ;;  %vm35_vm2 = vcmp.eq.s32.totalorder %v15_v5, %v165_v1  ;;  %vm36_vm3 = vcmp.eq.s32.totalorder %v16_v6, %v165_v1  ;;  %v21_v12 = vadd.s32 64, %v13_v3 }
   0x7   :  { %vm251_vm4 = vmpackc.low %vm34_vm1, %vm33_vm0  ;;  %vm37_vm6 = vcmp.eq.s32.totalorder %v17_v7, %v165_v1  ;;  %vm38_vm7 = vcmp.eq.s32.totalorder %v18_v8, %v165_v1  ;;  %vm39_vm9 = vcmp.eq.s32.totalorder %v19_v10, %v165_v1  ;;  %vm40_vm10 = vcmp.eq.s32.totalorder %v20_v11, %v165_v1 }
   0x8   :  { %252 = vmatprep.subr.msk.bf16.mxu0 %vm251_vm4, %v284_v9  ;;  %vm255_vm5 = vmpackc.low %vm36_vm3, %vm35_vm2  ;;  %v22_v13 = vadd.s32 72, %v13_v3  ;;  %vm41_vm12 = vcmp.eq.s32.totalorder %v21_v12, %v165_v1  ;;  %v23_v14 = vadd.s32 80, %v13_v3  ;;  %v24_v15 = vadd.s32 88, %v13_v3 }
   0x9   :  { %254 = vmatpush3.bf16.msk.msra.mxu0 %vm251_vm4, %v284_v9  ;;  %vm259_vm8 = vmpackc.low %vm38_vm7, %vm37_vm6  ;;  %v25_v16 = vadd.s32 96, %v13_v3  ;;  %v26_v17 = vadd.s32 104, %v13_v3  ;;  %v27_v18 = vadd.s32 112, %v13_v3  ;;  %v28_v19 = vadd.s32 120, %v13_v3 }
   0xa   :  { %256 = vmatprep.subr.msk.bf16.mxu0 %vm255_vm5, %v284_v9  ;;  %vm263_vm11 = vmpackc.low %vm40_vm10, %vm39_vm9  ;;  %vm42_vm13 = vcmp.eq.s32.totalorder %v22_v13, %v165_v1  ;;  %vm43_vm15 = vcmp.eq.s32.totalorder %v23_v14, %v165_v1  ;;  %vm44_vm0 = vcmp.eq.s32.totalorder %v24_v15, %v165_v1 }
   0xb   :  { %vm267_vm14 = vmpackc.low %vm42_vm13, %vm41_vm12  ;;  %vm45_vm2 = vcmp.eq.s32.totalorder %v25_v16, %v165_v1  ;;  %vm46_vm3 = vcmp.eq.s32.totalorder %v26_v17, %v165_v1  ;;  %vm48_vm6 = vcmp.eq.s32.totalorder %v28_v19, %v165_v1 }
   0xc   :  { %vm271_vm1 = vmpackc.low %vm44_vm0, %vm43_vm15 }
   0xd   :  { %258 = vmatpush3.bf16.msk.msra.mxu0 %vm255_vm5, %v284_v9  ;;  %vm275_vm4 = vmpackc.low %vm46_vm3, %vm45_vm2  ;;  %vm47_vm5 = vcmp.eq.s32.totalorder %v27_v18, %v165_v1 }
   0xe   :  { %260 = vmatprep.subr.msk.bf16.mxu0 %vm259_vm8, %v284_v9  ;;  %vm279_vm7 = vmpackc.low %vm48_vm6, %vm47_vm5 }
  0x11   :  { %262 = vmatpush3.bf16.msk.msra.mxu0 %vm259_vm8, %v284_v9  ;;  %vm158_vm8 = vcmask 523264  }
  0x12   :  { %264 = vmatprep.subr.msk.bf16.mxu0 %vm263_vm11, %v284_v9 }
  0x15   :  { %266 = vmatpush3.bf16.msk.msra.mxu0 %vm263_vm11, %v284_v9 }
  0x16   :  { %268 = vmatprep.subr.msk.bf16.mxu0 %vm267_vm14, %v284_v9 }
  0x19   :  { %270 = vmatpush3.bf16.msk.msra.mxu0 %vm267_vm14, %v284_v9 }
  0x1a   :  { %272 = vmatprep.subr.msk.bf16.mxu0 %vm271_vm1, %v284_v9 }
  0x1d   :  { %274 = vmatpush3.bf16.msk.msra.mxu0 %vm271_vm1, %v284_v9 }
  0x1e   :  { %276 = vmatprep.subr.msk.bf16.mxu0 %vm275_vm4, %v284_v9 }
  0x21   :  { %278 = vmatpush3.bf16.msk.msra.mxu0 %vm275_vm4, %v284_v9 }
  0x22   :  { %280 = vmatprep.subr.msk.bf16.mxu0 %vm279_vm7, %v284_v9 }
  0x25   :  { %282 = vmatpush3.bf16.msk.msra.mxu0 %vm279_vm7, %v284_v9 }
  0x28   :  { %249 = vmatmul.mubr.f32.vlgmr.msra.gmra.mrb[0].mxu0 %v82_v20 }
  0xfb   :  { %v250_v21 = vpop.f32.mrb[0].mxu0 }
  0xfc   :  { %160 = vst.msk [vmem:[%s317_s2 + $0x8] sm:$0xff] %vm158_vm8, %v250_v21  ;;  %v149_v22 = vpop.f32.mrb[1].mxu0 }
  0xfd   :  { %159 = vst.msk [vmem:[%s317_s2] sm:$0xff] %vm158_vm8, %v149_v22 }

</bundles_post_ra>
